<compile_context>
chip_gen: v6e
topology: v6e:2x2x1
jax: 0.10.0
libtpu: 0.0.40
codegen_flags: <defaults>
</compile_context>

<pallas_src>
import numpy as np
import jax
import jax.numpy as jnp
from jax.experimental import pallas as pl
from jax.experimental.pallas import tpu as pltpu


# --------------------------------------------------------------------------- #
# Kernel bodies
# --------------------------------------------------------------------------- #
def _identity_alias_kernel(x_ref, o_ref):
    # Input and output alias the same HBM buffer (input_output_aliases={0: 0}),
    # so the identity requires no data movement at all.
    del x_ref, o_ref


def _identity_dma_kernel(x_ref, o_ref, sem):
    # Single whole-array HBM -> HBM DMA: no VMEM staging, no vreg round trip.
    cp = pltpu.make_async_copy(x_ref, o_ref, sem)
    cp.start()
    cp.wait()


# --------------------------------------------------------------------------- #
# Wrappers
# --------------------------------------------------------------------------- #
def identity_pallas(x):
    """Identity as a true no-op Pallas call (aliased input/output, zero copies)."""
    return pl.pallas_call(
        _identity_alias_kernel,
        out_shape=jax.ShapeDtypeStruct(x.shape, x.dtype),
        in_specs=[pl.BlockSpec(memory_space=pl.ANY)],
        out_specs=pl.BlockSpec(memory_space=pl.ANY),
        input_output_aliases={0: 0},
    )(x)


def identity_pallas_copy(x):
    """Identity that materializes a fresh buffer via one direct HBM->HBM DMA."""
    return pl.pallas_call(
        _identity_dma_kernel,
        out_shape=jax.ShapeDtypeStruct(x.shape, x.dtype),
        in_specs=[pl.BlockSpec(memory_space=pl.ANY)],
        out_specs=pl.BlockSpec(memory_space=pl.ANY),
        scratch_shapes=[pltpu.SemaphoreType.DMA],
    )(x)


if __name__ == "__main__":
    # Small deterministic input consistent with the module's forward:
    # batch=2, channels=4, spatial=16x16.
    key = jax.random.PRNGKey(0)
    x = jax.random.normal(key, (2, 4, 16, 16), dtype=jnp.float32)

    # Default (zero-copy, aliased) path.
    out = jax.block_until_ready(identity_pallas(x))
    np.testing.assert_array_equal(np.asarray(out), np.asarray(x))
    assert out.shape == x.shape and out.dtype == x.dtype

    # Materializing-copy path (single whole-array HBM -> HBM DMA).
    out_copy = jax.block_until_ready(identity_pallas_copy(x))
    np.testing.assert_array_equal(np.asarray(out_copy), np.asarray(x))
    assert out_copy.shape == x.shape and out_copy.dtype == x.dtype

    print("KERNEL_OK")
</pallas_src>

<mosaic_0001>
module attributes {stable_mosaic.version = 11 : i64} {
  func.func @_identity_alias_kernel(%arg0: memref<2x4x16x16xf32, #tpu.memory_space<any>>, %arg1: memref<2x4x16x16xf32, #tpu.memory_space<any>>) attributes {dimension_semantics = [], scalar_prefetch = 0 : i64, scratch_operands = 0 : i64, tpu.core_type = #tpu.core_type<tc>} {
    return
  }
}

</mosaic_0001>

<bundles_post_ra>
// kernel: tpu_custom_call.1
= control target key start
LH: loop header
LB: loop body
LE: loop exit
PB: predicated region body
PF: predicated region fallthrough
CT: control target
= control target key end

     0   :  { %s16_s0 = inlined_call_operand.hbm [shape: f32[2,4,16,16], index: 0, kind: input, shape index: {}, may-alias: {0,1}]   ;;  %s17_s1 = inlined_call_operand.hbm [shape: f32[2,4,16,16], index: 1, kind: output, shape index: {}, may-alias: {0,1}]  }

</bundles_post_ra>
